<compile_context>
chip_gen: v5e
topology: v5e:2x2
jax: 0.10.0
libtpu: 0.0.40
codegen_flags: <defaults>
</compile_context>

<pallas_src>
import math
import functools

import jax
import jax.numpy as jnp
from jax.experimental import pallas as pl
from jax.experimental.pallas import tpu as pltpu


# ----------------------------------------------------------------------------
# tile-size helper: full-extent block when the dim is small, otherwise the
# largest hardware-aligned tile that divides the dimension.
# (second-to-last dims: align 8; lane dims: align 128; full extent always legal)
# ----------------------------------------------------------------------------
def _pick_tile(dim, preferred, align):
    if dim <= preferred:
        return dim
    t = (preferred // align) * align
    while t >= align:
        if dim % t == 0:
            return t
        t -= align
    return dim  # correctness-safe fallback: full extent


# ----------------------------------------------------------------------------
# kernel: tiled K-accumulating matmul  y = x @ w + b  (optional ReLU)
# ----------------------------------------------------------------------------
def _linear_kernel(x_ref, w_ref, b_ref, o_ref, acc_ref, *, activation):
    k = pl.program_id(2)

    @pl.when(k == 0)
    def _():
        acc_ref[...] = jnp.zeros_like(acc_ref)

    acc_ref[...] += jnp.dot(
        x_ref[...].astype(jnp.bfloat16),
        w_ref[...].astype(jnp.bfloat16),
        preferred_element_type=jnp.float32,
    )

    @pl.when(k == pl.num_programs(2) - 1)
    def _():
        # bias / activation only once, in the finalize step
        y = acc_ref[...] + b_ref[...]
        if activation == "relu":
            y = jnp.maximum(y, 0.0)
        o_ref[...] = y.astype(o_ref.dtype)


def linear(x, w, b, activation=None):
    M, K = x.shape
    K2, N = w.shape
    assert K == K2
    tm = _pick_tile(M, 256, 8)
    tk = _pick_tile(K, 512, 128)
    tn = _pick_tile(N, 512, 128)
    grid = (M // tm, N // tn, K // tk)
    return pl.pallas_call(
        functools.partial(_linear_kernel, activation=activation),
        out_shape=jax.ShapeDtypeStruct((M, N), jnp.float32),
        grid=grid,
        in_specs=[
            pl.BlockSpec((tm, tk), lambda i, j, k: (i, k)),
            pl.BlockSpec((tk, tn), lambda i, j, k: (k, j)),
            pl.BlockSpec((1, tn), lambda i, j, k: (0, j)),
        ],
        out_specs=pl.BlockSpec((tm, tn), lambda i, j, k: (i, j)),
        scratch_shapes=[pltpu.VMEM((tm, tn), jnp.float32)],
        compiler_params=pltpu.CompilerParams(
            dimension_semantics=("parallel", "parallel", "arbitrary")),
    )(x, w, b.reshape(1, N))


# ----------------------------------------------------------------------------
# kernel: tiled matmul with fused residual-add + LayerNorm epilogue
#   o = LayerNorm(res + (x @ w + b))          (LN over the full N = D axis)
# ----------------------------------------------------------------------------
def _proj_add_ln_kernel(x_ref, w_ref, b_ref, r_ref, g_ref, be_ref,
                        o_ref, acc_ref, *, eps):
    k = pl.program_id(1)

    @pl.when(k == 0)
    def _():
        acc_ref[...] = jnp.zeros_like(acc_ref)

    acc_ref[...] += jnp.dot(
        x_ref[...].astype(jnp.bfloat16),
        w_ref[...].astype(jnp.bfloat16),
        preferred_element_type=jnp.float32,
    )

    @pl.when(k == pl.num_programs(1) - 1)
    def _():
        y = acc_ref[...] + b_ref[...] + r_ref[...]
        mean = jnp.mean(y, axis=-1, keepdims=True)
        var = jnp.mean((y - mean) ** 2, axis=-1, keepdims=True)
        yhat = (y - mean) * jax.lax.rsqrt(var + eps)
        o_ref[...] = (yhat * g_ref[...] + be_ref[...]).astype(o_ref.dtype)


def proj_add_layernorm(x, w, b, res, gamma, beta, eps=1e-5):
    M, K = x.shape
    K2, N = w.shape
    assert K == K2 and res.shape == (M, N)
    tm = _pick_tile(M, 256, 8)
    tk = _pick_tile(K, 512, 128)
    grid = (M // tm, K // tk)
    return pl.pallas_call(
        functools.partial(_proj_add_ln_kernel, eps=eps),
        out_shape=jax.ShapeDtypeStruct((M, N), jnp.float32),
        grid=grid,
        in_specs=[
            pl.BlockSpec((tm, tk), lambda i, k: (i, k)),
            pl.BlockSpec((tk, N), lambda i, k: (k, 0)),
            pl.BlockSpec((1, N), lambda i, k: (0, 0)),
            pl.BlockSpec((tm, N), lambda i, k: (i, 0)),
            pl.BlockSpec((1, N), lambda i, k: (0, 0)),
            pl.BlockSpec((1, N), lambda i, k: (0, 0)),
        ],
        out_specs=pl.BlockSpec((tm, N), lambda i, k: (i, 0)),
        scratch_shapes=[pltpu.VMEM((tm, N), jnp.float32)],
        compiler_params=pltpu.CompilerParams(
            dimension_semantics=("parallel", "arbitrary")),
    )(x, w, b.reshape(1, N), res, gamma.reshape(1, N), beta.reshape(1, N))


# ----------------------------------------------------------------------------
# kernel: fused FFN + residual + LayerNorm
#   o = LayerNorm(x + (relu(x @ W1 + b1) @ W2 + b2))
# The (tm, FF) intermediate lives only in VMEM/vregs.
# ----------------------------------------------------------------------------
def _ffn_add_ln_kernel(x_ref, w1_ref, b1_ref, w2_ref, b2_ref, g_ref, be_ref,
                       o_ref, *, eps):
    x = x_ref[...]
    h = jnp.dot(x.astype(jnp.bfloat16), w1_ref[...].astype(jnp.bfloat16),
                preferred_element_type=jnp.float32) + b1_ref[...]
    h = jnp.maximum(h, 0.0)
    y = jnp.dot(h.astype(jnp.bfloat16), w2_ref[...].astype(jnp.bfloat16),
                preferred_element_type=jnp.float32) + b2_ref[...]
    y = y + x  # residual
    mean = jnp.mean(y, axis=-1, keepdims=True)
    var = jnp.mean((y - mean) ** 2, axis=-1, keepdims=True)
    yhat = (y - mean) * jax.lax.rsqrt(var + eps)
    o_ref[...] = (yhat * g_ref[...] + be_ref[...]).astype(o_ref.dtype)


def ffn_add_layernorm(x, w1, b1, w2, b2, gamma, beta, eps=1e-5):
    M, D = x.shape
    D2, FF = w1.shape
    assert D == D2 and w2.shape == (FF, D)
    tm = _pick_tile(M, 256, 8)
    grid = (M // tm,)
    return pl.pallas_call(
        functools.partial(_ffn_add_ln_kernel, eps=eps),
        out_shape=jax.ShapeDtypeStruct((M, D), jnp.float32),
        grid=grid,
        in_specs=[
            pl.BlockSpec((tm, D), lambda i: (i, 0)),
            pl.BlockSpec((D, FF), lambda i: (0, 0)),
            pl.BlockSpec((1, FF), lambda i: (0, 0)),
            pl.BlockSpec((FF, D), lambda i: (0, 0)),
            pl.BlockSpec((1, D), lambda i: (0, 0)),
            pl.BlockSpec((1, D), lambda i: (0, 0)),
            pl.BlockSpec((1, D), lambda i: (0, 0)),
        ],
        out_specs=pl.BlockSpec((tm, D), lambda i: (i, 0)),
        compiler_params=pltpu.CompilerParams(
            dimension_semantics=("parallel",)),
    )(x, w1, b1.reshape(1, FF), w2, b2.reshape(1, D),
      gamma.reshape(1, D), beta.reshape(1, D))


# ----------------------------------------------------------------------------
# kernel: multi-head self-attention.  One grid step per batch element;
# all heads of that batch are processed from a lane-dense (S, 3D) QKV slab.
# Head split/merge happens via in-kernel column slices; the context is stored
# as a single concatenated (S, D) slab, so no transposes are ever needed.
# Attention probabilities are only produced when a p_ref output is present
# (last encoder layer).
# ----------------------------------------------------------------------------
def _attention_kernel(qkv_ref, o_ref, *p_refs, H, Dh, scale):
    # TODO(synk): attention mask not supported (forward is exercised with mask=None).
    qkv = qkv_ref[...]            # (S, 3*D), fp32, lane-dense load
    D = H * Dh
    ctx_cols = []
    p_heads = []
    for h in range(H):            # H is small & static -> unrolled
        q = qkv[:, h * Dh:(h + 1) * Dh]
        k = qkv[:, D + h * Dh: D + (h + 1) * Dh]
        v = qkv[:, 2 * D + h * Dh: 2 * D + (h + 1) * Dh]
        s = jnp.dot(q.astype(jnp.bfloat16), k.astype(jnp.bfloat16).T,
                    preferred_element_type=jnp.float32) * scale
        s = s - jnp.max(s, axis=-1, keepdims=True)
        e = jnp.exp(s)
        p = e * pl.reciprocal(jnp.sum(e, axis=-1, keepdims=True), approx=True)
        ctx_cols.append(jnp.dot(p.astype(jnp.bfloat16), v.astype(jnp.bfloat16),
                                preferred_element_type=jnp.float32))
        if p_refs:
            p_heads.append(p)
    # single lane-dense (S, D) store; heads are already merged column-wise
    o_ref[...] = jnp.concatenate(ctx_cols, axis=-1).astype(o_ref.dtype)
    if p_refs:
        p_refs[0][0] = jnp.stack(p_heads, axis=0).astype(p_refs[0].dtype)


def mha(qkv, B, S, D, H, return_probs):
    # TODO(synk): for long S, switch to a flash-style online-softmax with a KV
    # grid axis so the SxS scores never exceed VMEM (not needed at these sizes).
    Dh = D // H
    M = B * S
    in_specs = [pl.BlockSpec((S, 3 * D), lambda b: (b, 0))]
    out_shape = [jax.ShapeDtypeStruct((M, D), jnp.float32)]
    out_specs = [pl.BlockSpec((S, D), lambda b: (b, 0))]
    if return_probs:
        out_shape.append(jax.ShapeDtypeStruct((B, H, S, S), jnp.float32))
        out_specs.append(pl.BlockSpec((1, H, S, S), lambda b: (b, 0, 0, 0)))
    out = pl.pallas_call(
        functools.partial(_attention_kernel, H=H, Dh=Dh,
                          scale=1.0 / math.sqrt(Dh)),
        out_shape=tuple(out_shape),
        grid=(B,),
        in_specs=in_specs,
        out_specs=tuple(out_specs),
        compiler_params=pltpu.CompilerParams(
            dimension_semantics=("parallel",)),
    )(qkv)
    if return_probs:
        return out[0], out[1]
    return out[0], None


# ----------------------------------------------------------------------------
# model glue (plain JAX): parameters, embedding lookup, encoder stack
# ----------------------------------------------------------------------------
def sinusoidal_pe(max_length, dim):
    pos = jnp.arange(max_length, dtype=jnp.float32)[:, None]
    i = jnp.arange(dim // 2, dtype=jnp.float32)[None, :]
    angle = pos / jnp.power(10000.0, (2.0 * i) / dim)
    pe = jnp.zeros((max_length, dim), jnp.float32)
    pe = pe.at[:, 0::2].set(jnp.sin(angle))
    pe = pe.at[:, 1::2].set(jnp.cos(angle))
    return pe


def init_params(key, cfg):
    D, FF, V, C, L = (cfg["embed_dim"], cfg["ff_dim"], cfg["vocab_size"],
                      cfg["num_classes"], cfg["num_layers"])

    def dense(k, fan_in, fan_out):
        return 0.02 * jax.random.normal(k, (fan_in, fan_out), jnp.float32)

    keys = jax.random.split(key, 2 + L)
    params = {
        "embed": 0.02 * jax.random.normal(keys[0], (V, D), jnp.float32),
        "pe": sinusoidal_pe(cfg["max_length"], D),
        "fc_out_w": dense(keys[1], D, C),
        "fc_out_b": jnp.zeros((C,), jnp.float32),
        "layers": [],
    }
    for l in range(L):
        lk = jax.random.split(keys[2 + l], 6)
        wq, wk, wv = dense(lk[0], D, D), dense(lk[1], D, D), dense(lk[2], D, D)
        params["layers"].append({
            # fused QKV projection weight (D, 3D)
            "wqkv": jnp.concatenate([wq, wk, wv], axis=1),
            "bqkv": jnp.zeros((3 * D,), jnp.float32),
            "wo": dense(lk[3], D, D), "bo": jnp.zeros((D,), jnp.float32),
            "w1": dense(lk[4], D, FF), "b1": jnp.zeros((FF,), jnp.float32),
            "w2": dense(lk[5], FF, D), "b2": jnp.zeros((D,), jnp.float32),
            "ln1_g": jnp.ones((D,), jnp.float32), "ln1_b": jnp.zeros((D,), jnp.float32),
            "ln2_g": jnp.ones((D,), jnp.float32), "ln2_b": jnp.zeros((D,), jnp.float32),
        })
    return params


def encoder_layer(x2, p, B, S, D, H, return_probs):
    # fused Q/K/V projection: one tiled matmul
    qkv = linear(x2, p["wqkv"], p["bqkv"])                       # (B*S, 3D)
    # multi-head attention; context comes back already head-merged (B*S, D)
    ctx, attn = mha(qkv, B, S, D, H, return_probs)
    # output projection with fused residual + LayerNorm epilogue
    x2 = proj_add_layernorm(ctx, p["wo"], p["bo"], x2, p["ln1_g"], p["ln1_b"])
    # fused FFN (W1 + ReLU + W2) with residual + LayerNorm epilogue
    x2 = ffn_add_layernorm(x2, p["w1"], p["b1"], p["w2"], p["b2"],
                           p["ln2_g"], p["ln2_b"])
    return x2, attn


def classification_model_forward(params, tokens, cfg, mask=None):
    if mask is not None:
        # TODO(synk): attention mask plumbing not implemented (spec only
        # exercises mask=None).
        raise NotImplementedError("attention mask not supported")
    B, S = tokens.shape
    D, H, C = cfg["embed_dim"], cfg["num_heads"], cfg["num_classes"]
    L = cfg["num_layers"]

    # embedding lookup + sinusoidal positional encoding (glue, plain JAX)
    x = params["embed"][tokens] * jnp.float32(math.sqrt(D)) + params["pe"][:S][None]
    x2 = x.reshape(B * S, D)

    attn = None
    for l, lp in enumerate(params["layers"]):
        # only the last layer materializes/writes the attention probabilities
        x2, a = encoder_layer(x2, lp, B, S, D, H, return_probs=(l == L - 1))
        if a is not None:
            attn = a

    logits = linear(x2, params["fc_out_w"], params["fc_out_b"])
    return logits.reshape(B, S, C), attn


# ----------------------------------------------------------------------------
if __name__ == "__main__":
    cfg = dict(vocab_size=100, embed_dim=32, max_length=16, num_layers=2,
               num_heads=4, ff_dim=64, num_classes=5)
    B, S = 2, 8

    key = jax.random.PRNGKey(0)
    pkey, tkey = jax.random.split(key)
    params = init_params(pkey, cfg)
    tokens = jax.random.randint(tkey, (B, S), 0, cfg["vocab_size"], dtype=jnp.int32)

    logits, attn = classification_model_forward(params, tokens, cfg, mask=None)
    logits = jax.block_until_ready(logits)
    attn = jax.block_until_ready(attn)

    assert logits.shape == (B, S, cfg["num_classes"])
    assert attn.shape == (B, cfg["num_heads"], S, S)
    assert bool(jnp.all(jnp.isfinite(logits)))
    assert bool(jnp.all(jnp.isfinite(attn)))
    print("KERNEL_OK")
</pallas_src>

<mosaic_0001>
module attributes {stable_mosaic.version = 11 : i64} {
  func.func @_linear_kernel(%arg0: i32, %arg1: i32, %arg2: i32, %arg3: memref<16x32xf32, #tpu.memory_space<vmem>>, %arg4: memref<32x96xf32, #tpu.memory_space<vmem>>, %arg5: memref<1x96xf32, #tpu.memory_space<vmem>>, %arg6: memref<16x96xf32, #tpu.memory_space<vmem>>, %arg7: memref<16x96xf32, #tpu.memory_space<vmem>>) attributes {dimension_semantics = [#tpu.dimension_semantics<parallel>, #tpu.dimension_semantics<parallel>, #tpu.dimension_semantics<arbitrary>], iteration_bounds = array<i64: 1, 1, 1>, scalar_prefetch = 0 : i64, scratch_operands = 1 : i64, tpu.core_type = #tpu.core_type<tc>, window_params = [{transform_indices = @transform_0, window_bounds = array<i64: 16, 32>}, {transform_indices = @transform_1, window_bounds = array<i64: 32, 96>}, {transform_indices = @transform_2, window_bounds = array<i64: 1, 96>}, {transform_indices = @transform_3, window_bounds = array<i64: 16, 96>}]} {
    %c0_i32 = arith.constant 0 : i32
    %0 = arith.cmpi eq, %arg2, %c0_i32 : i32
    %1 = arith.extui %0 : i1 to i32
    %c0_i32_0 = arith.constant 0 : i32
    %2 = arith.cmpi ne, %1, %c0_i32_0 : i32
    scf.if %2 {
      %cst_10 = arith.constant 0.000000e+00 : f32
      %14 = vector.broadcast %cst_10 : f32 to vector<16x96xf32>
      %c0_11 = arith.constant 0 : index
      %c0_12 = arith.constant 0 : index
      %15 = vector.load %arg7[%c0_11, %c0_12] : memref<16x96xf32, #tpu.memory_space<vmem>>, vector<16x96xf32>
      tpu.vector_store %arg7[%c0_11, %c0_12], %14 {strides = array<i32>} : memref<16x96xf32, #tpu.memory_space<vmem>>, vector<16x96xf32>,
    } else {
    }
    %c0 = arith.constant 0 : index
    %c0_1 = arith.constant 0 : index
    %3 = vector.load %arg7[%c0, %c0_1] : memref<16x96xf32, #tpu.memory_space<vmem>>, vector<16x96xf32>
    %c0_2 = arith.constant 0 : index
    %c0_3 = arith.constant 0 : index
    %4 = vector.load %arg3[%c0_2, %c0_3] : memref<16x32xf32, #tpu.memory_space<vmem>>, vector<16x32xf32>
    %5 = arith.truncf %4 : vector<16x32xf32> to vector<16x32xbf16>
    %c0_4 = arith.constant 0 : index
    %c0_5 = arith.constant 0 : index
    %6 = vector.load %arg4[%c0_4, %c0_5] : memref<32x96xf32, #tpu.memory_space<vmem>>, vector<32x96xf32>
    %7 = arith.truncf %6 : vector<32x96xf32> to vector<32x96xbf16>
    %cst = arith.constant dense<0.000000e+00> : vector<16x96xf32>
    %8 = tpu.matmul %5, %7, %cst {dimension_numbers = #tpu.dot_dimension_numbers<[1], [0], [0], [1], [0, 0, 1, 1], [], []>} : vector<16x32xbf16>, vector<32x96xbf16>, vector<16x96xf32> -> vector<16x96xf32>
    %9 = arith.addf %3, %8 : vector<16x96xf32>
    %c0_6 = arith.constant 0 : index
    %c0_7 = arith.constant 0 : index
    %10 = vector.load %arg7[%c0_6, %c0_7] : memref<16x96xf32, #tpu.memory_space<vmem>>, vector<16x96xf32>
    tpu.vector_store %arg7[%c0_6, %c0_7], %9 {strides = array<i32>} : memref<16x96xf32, #tpu.memory_space<vmem>>, vector<16x96xf32>,
    %c0_i32_8 = arith.constant 0 : i32
    %11 = arith.cmpi eq, %arg2, %c0_i32_8 : i32
    %12 = arith.extui %11 : i1 to i32
    %c0_i32_9 = arith.constant 0 : i32
    %13 = arith.cmpi ne, %12, %c0_i32_9 : i32
    scf.if %13 {
      %c0_10 = arith.constant 0 : index
      %c0_11 = arith.constant 0 : index
      %14 = vector.load %arg7[%c0_10, %c0_11] : memref<16x96xf32, #tpu.memory_space<vmem>>, vector<16x96xf32>
      %c0_12 = arith.constant 0 : index
      %c0_13 = arith.constant 0 : index
      %15 = vector.load %arg5[%c0_12, %c0_13] : memref<1x96xf32, #tpu.memory_space<vmem>>, vector<1x96xf32>
      %16 = vector.broadcast %15 : vector<1x96xf32> to vector<16x96xf32>
      %17 = arith.addf %14, %16 : vector<16x96xf32>
      %c0_14 = arith.constant 0 : index
      %c0_15 = arith.constant 0 : index
      %18 = vector.load %arg6[%c0_14, %c0_15] : memref<16x96xf32, #tpu.memory_space<vmem>>, vector<16x96xf32>
      tpu.vector_store %arg6[%c0_14, %c0_15], %17 {strides = array<i32>} : memref<16x96xf32, #tpu.memory_space<vmem>>, vector<16x96xf32>,
    } else {
    }
    return
  }
  func.func @transform_0(%arg0: i32, %arg1: i32, %arg2: i32) -> (i32, i32) {
    %c0_i32 = arith.constant 0 : i32
    return %arg0, %arg2 : i32, i32
  }
  func.func @transform_1(%arg0: i32, %arg1: i32, %arg2: i32) -> (i32, i32) {
    %c0_i32 = arith.constant 0 : i32
    return %arg2, %arg1 : i32, i32
  }
  func.func @transform_2(%arg0: i32, %arg1: i32, %arg2: i32) -> (i32, i32) {
    %c0_i32 = arith.constant 0 : i32
    %c0_i32_0 = arith.constant 0 : i32
    return %c0_i32, %arg1 : i32, i32
  }
  func.func @transform_3(%arg0: i32, %arg1: i32, %arg2: i32) -> (i32, i32) {
    %c0_i32 = arith.constant 0 : i32
    return %arg0, %arg1 : i32, i32
  }
}

</mosaic_0001>

<bundles_post_ra>
// kernel: tpu_custom_call.1
= control target key start
LH: loop header
LB: loop body
LE: loop exit
PB: predicated region body
PF: predicated region fallthrough
CT: control target
= control target key end

     0   :  { %8 = vsyncpa [#allocation4], 0  ;;  %s261_s0 = inlined_call_operand.hbm [shape: f32[16,32], index: 0, kind: input, shape index: {}]   ;;  %s262_s1 = inlined_call_operand.hbm [shape: f32[32,96], index: 1, kind: input, shape index: {}]   ;;  %s263_s2 = inlined_call_operand.vmem [shape: f32[1,96], index: 2, kind: input, shape index: {}]   ;;  %s264_s3 = inlined_call_operand.hbm [shape: f32[16,96], index: 3, kind: output, shape index: {}]  }
   0x1   :  { %9 = vsyncpa [#allocation7], 0 }
   0x2   :  { %10 = vsyncpa [#allocation5], 0  ;;  %s15_s14 = sshll.u32 %s261_s0, 4  ;;  %s208_s15 = smov [#allocation3]   ;;  %s16_s14 = int_to_ptr.hbm [resolvable:$true] %s15_s14 }
   0x3   :  { %s17_s16 = sshll.u32 %s208_s15, 4  ;;  %s28_s19 = sshll.u32 %s262_s1, 4  ;;  %s18_s16 = int_to_ptr.vmem [resolvable:$true] %s17_s16  ;;  %s29_s19 = int_to_ptr.hbm [resolvable:$true] %s28_s19 }
   0x4   :  { %s209_s20 = smov 128   ;;  %s210_s21 = smov 8  }
   0x5   :  { %23 = dma.hbm_to_vmem [thread:$0]  %s16_s14, 256, %s18_s16, [#allocation4], %s209_s20, %s209_s20, %s210_s21  }
   0x6   :  { %s211_s22 = smov [#allocation6]  }
   0x7   :  { %s30_s23 = sshll.u32 %s211_s22, 4  ;;  %s31_s23 = int_to_ptr.vmem [resolvable:$true] %s30_s23 }
   0x8   :  { %36 = dma.hbm_to_vmem [thread:$0]  %s29_s19, 512, %s31_s23, [#allocation7], %s209_s20, %s209_s20, %s210_s21  }
   0x9   :  { %202 = dma.done.wait [#allocation4], 256  }
   0xa   :  { %203 = vsyncadd [#allocation4], 4294967040 }
   0xb   :  { %204 = dma.done.wait [#allocation7], 512  }
   0xc   :  { %205 = vsyncadd [#allocation7], 4294966784  ;;  %vm52_vm0 = vcmask 785408   ;;  %v212_v0 = vmov 0.0   ;;  %v62_v1 = vld [vmem:[#allocation6 + $0x10] sm:$0xff]  ;;  %v63_v2 = vld [vmem:[#allocation6 + $0x18] sm:$0xff] }
   0xd   :  { %53 = vst.msk [vmem:[#allocation2] sm:$0xff] %vm52_vm0, %v212_v0  ;;  %v60_v3 = vld [vmem:[#allocation6] sm:$0xff]  ;;  %v65_v4 = vpack.c.bf16 %v63_v2, %v62_v1  ;;  %v61_v5 = vld [vmem:[#allocation6 + $0x8] sm:$0xff]  ;;  %v57_v7 = vld [vmem:[#allocation3] sm:$0xff]  ;;  %vm66_vm1 = vcmask 261120   ;;  %s213_s24 = smov [#allocation8]  }
   0xe   :  { %54 = vst.msk [vmem:[#allocation2 + $0x8] sm:$0xff] %vm52_vm0, %v212_v0  ;;  %v64_v6 = vpack.c.bf16 %v61_v5, %v60_v3  ;;  %v58_v8 = vld [vmem:[#allocation3 + $0x8] sm:$0xff]  ;;  %v129_v14 = vld [vmem:[%s263_s2] ss:$0 sm:$0xff]  ;;  %s106_s25 = sshll.u32 %s213_s24, 4  ;;  %s108_s28 = sshll.u32 %s264_s3, 4  ;;  %s107_s25 = int_to_ptr.vmem [resolvable:$true] %s106_s25  ;;  %s109_s28 = int_to_ptr.hbm [resolvable:$true] %s108_s28 }
   0xf   :  { %76 = vmatpush.bf16.msra.mxu0 %v65_v4  ;;  %v59_v9 = vpack.c.bf16 %v58_v8, %v57_v7 }
  0x13   :  { %77 = vmatpush.bf16.msra.mxu0 %v64_v6 }
  0x14   :  { %v55_v10 = vld [vmem:[#allocation2] sm:$0xff] }
  0x15   :  { %v56_v13 = vld [vmem:[#allocation2 + $0x8] sm:$0xff] }
  0x16   :  { %122 = vmatmul.msk.bf16.vlgmr.msra.gmra.mxu0 %vm66_vm1, %v59_v9 }
  0x93   :  { %v79_v11 = vpop.f32.mrf.mxu0 }
  0x94   :  { %v84_v12 = vadd.f32 %v79_v11, %v55_v10 }
  0x96   :  { %87 = vst.msk [vmem:[#allocation2] sm:$0xff] %vm52_vm0, %v84_v12 }
  0x9b   :  { %v81_v15 = vpop.f32.mrf.mxu0 }
  0x9c   :  { %v85_v16 = vadd.f32 %v81_v15, %v56_v13 }
  0x9d   :  { %v92_v17 = vld [vmem:[#allocation2] sm:$0xff] }
  0x9e   :  { %88 = vst.msk [vmem:[#allocation2 + $0x8] sm:$0xff] %vm52_vm0, %v85_v16  ;;  %v98_v18 = vadd.f32 %v129_v14, %v92_v17 }
  0xa0   :  { %100 = vst.msk [vmem:[#allocation8] sm:$0xff] %vm52_vm0, %v98_v18 }
  0xa5   :  { %v93_v19 = vld [vmem:[#allocation2 + $0x8] sm:$0xff] }
  0xa6   :  { %v99_v20 = vadd.f32 %v129_v14, %v93_v19 }
  0xa8   :  { %101 = vst.msk [vmem:[#allocation8 + $0x8] sm:$0xff] %vm52_vm0, %v99_v20 }
  0xa9   :  { %114 = dma.vmem_to_hbm [thread:$0]  %s107_s25, 256, %s109_s28, [#allocation5], %s209_s20, %s209_s20, %s210_s21  }
  0xaa   :  { %206 = dma.done.wait [#allocation5], 256  }
  0xab   :  { %207 = vsyncadd [#allocation5], 4294967040 }
  0xac   :  { %119 = vsyncpa [#allocation4], 1 }
  0xad   :  { %120 = vsyncpa [#allocation7], 1 }
  0xae   :  { %121 = vsyncpa [#allocation5], 1 }

</bundles_post_ra>
